<compile_context>
chip_gen: v6e
topology: v6e:2x2x1
jax: 0.10.0
libtpu: 0.0.40
codegen_flags: <defaults>
</compile_context>

<pallas_src>
import functools

import jax
import jax.numpy as jnp
from jax.experimental import pallas as pl
from jax.experimental.pallas import tpu as pltpu


_FUSE_T_MIN_M = 64     # min per-frame Ho*Wo to use the temporally-fused conv path
_TM_PREF = 512         # preferred M tile (fits scoped VMEM on v5e/v6e/v7x)


def _round_up(x, m):
    return (x + m - 1) // m * m


def _choose_tm(m):
    """Pick the M tile: full (rounded to sublanes) when small, else a divisor."""
    if m <= _TM_PREF:
        t = m if m % 8 == 0 else _round_up(m, 8)
        return t, t
    for t in range(_TM_PREF, 127, -8):
        if m % t == 0:
            return t, m
    return _TM_PREF, _round_up(m, _TM_PREF)


# -----------------------------------------------------------------------------
# Pallas kernel 1: fused conv-as-matmul with the temporal taps on the grid.
#   out[n, t, m, :] = act( sum_dz A[n, t*sd + dz, m, :] @ W[dz] + bias )
# Accumulation in f32 on the MXU; activations are bf16.
# -----------------------------------------------------------------------------
def _conv_mm_kernel(a_ref, b_ref, bias_ref, o_ref, acc_ref, *, relu):
    c = pl.program_id(3)

    @pl.when(c == 0)
    def _():
        acc_ref[...] = jnp.zeros_like(acc_ref)

    acc_ref[...] += jnp.dot(a_ref[...], b_ref[...],
                            preferred_element_type=jnp.float32)

    @pl.when(c == pl.num_programs(3) - 1)
    def _():
        out = acc_ref[...] + bias_ref[...]
        if relu:
            out = jnp.maximum(out, 0.0)
        o_ref[...] = out.astype(o_ref.dtype)


def conv_matmul(a, w, bias, *, relu, t_stride=1):
    """a: (N, Tin, M, K) bf16 patches; w: (kd, Kw, Cout) bf16 (Kw >= K, zero-row
    padded); bias: (1, Cout) f32.  Returns (N, To, M, Cout) bf16."""
    N, Tin, M, K = a.shape
    kd, Kw, Cout = w.shape
    if K != Kw:            # only the RGB stem (K = 7*7*3 = 147) pads up to 256
        a = jnp.pad(a, ((0, 0), (0, 0), (0, 0), (0, Kw - K)))
        K = Kw
    To = (Tin - kd) // t_stride + 1
    tm, Mp = _choose_tm(M)
    if Mp != M:
        a = jnp.pad(a, ((0, 0), (0, 0), (0, Mp - M), (0, 0)))

    out = pl.pallas_call(
        functools.partial(_conv_mm_kernel, relu=relu),
        out_shape=jax.ShapeDtypeStruct((N, To, Mp, Cout), jnp.bfloat16),
        grid=(N, To, Mp // tm, kd),
        in_specs=[
            # block-size-1 T dim: block index == frame index, so the shifted
            # frame for temporal tap `c` is just t*t_stride + c.
            pl.BlockSpec((None, None, tm, K),
                         lambda n, t, i, c: (n, t * t_stride + c, i, 0)),
            pl.BlockSpec((None, K, Cout), lambda n, t, i, c: (c, 0, 0)),
            pl.BlockSpec((1, Cout), lambda n, t, i, c: (0, 0)),
        ],
        out_specs=pl.BlockSpec((None, None, tm, Cout),
                               lambda n, t, i, c: (n, t, i, 0)),
        scratch_shapes=[pltpu.VMEM((tm, Cout), jnp.float32)],
        compiler_params=pltpu.CompilerParams(
            dimension_semantics=("parallel", "parallel", "parallel", "arbitrary")),
    )(a, w, bias)
    if Mp != M:
        out = out[:, :, :M]
    return out


# -----------------------------------------------------------------------------
# Pallas kernel 2: pooling as a running max/sum over window taps on the grid.
# Spatial taps come pre-sliced (already decimated by the stride); temporal taps
# are indexed on the grid, so no kd*kh*kw window stack is ever written to HBM.
# -----------------------------------------------------------------------------
def _pool_kernel(w_ref, o_ref, acc_ref, *, op, inv_win):
    c = pl.program_id(3)
    x = w_ref[...].astype(jnp.float32)

    @pl.when(c == 0)
    def _():
        acc_ref[...] = x

    @pl.when(c > 0)
    def _():
        if op == "max":
            acc_ref[...] = jnp.maximum(acc_ref[...], x)
        else:
            acc_ref[...] = acc_ref[...] + x

    @pl.when(c == pl.num_programs(3) - 1)
    def _():
        r = acc_ref[...]
        if op == "mean":
            r = r * inv_win
        o_ref[...] = r.astype(o_ref.dtype)


def pool3d(x, ksize, stride, op, same_pad):
    """x: (N, T, H, W, C) bf16 -> (N, To, Ho, Wo, C)."""
    kd, kh, kw = ksize
    sd, sh, sw = stride
    if same_pad:
        # Zero padding like F.pad; matches the reference max-pool because every
        # pooled tensor in I3D is post-ReLU (>= 0).
        x = _pad_same_5d(x, ksize, stride)
    N, Tp, Hp, Wp, C = x.shape
    To = (Tp - kd) // sd + 1
    Ho = (Hp - kh) // sh + 1
    Wo = (Wp - kw) // sw + 1
    M = Ho * Wo
    slabs = []
    for dy in range(kh):
        for dx in range(kw):
            slabs.append(x[:, :, dy:dy + (Ho - 1) * sh + 1:sh,
                           dx:dx + (Wo - 1) * sw + 1:sw, :].reshape(N, Tp, M, C))
    ws = jnp.stack(slabs, axis=2)          # (N, Tp, kh*kw, M, C)
    ksp = kh * kw
    tm, Mp = _choose_tm(M)
    if Mp != M:
        ws = jnp.pad(ws, ((0, 0), (0, 0), (0, 0), (0, Mp - M), (0, 0)))

    out = pl.pallas_call(
        functools.partial(_pool_kernel, op=op, inv_win=1.0 / (kd * kh * kw)),
        out_shape=jax.ShapeDtypeStruct((N, To, Mp, C), jnp.bfloat16),
        grid=(N, To, Mp // tm, kd * ksp),
        in_specs=[pl.BlockSpec(
            (None, None, None, tm, C),
            lambda n, t, i, c: (n, t * sd + c // ksp, c % ksp, i, 0))],
        out_specs=pl.BlockSpec((None, None, tm, C),
                               lambda n, t, i, c: (n, t, i, 0)),
        scratch_shapes=[pltpu.VMEM((tm, C), jnp.float32)],
        compiler_params=pltpu.CompilerParams(
            dimension_semantics=("parallel", "parallel", "parallel", "arbitrary")),
    )(ws)
    if Mp != M:
        out = out[:, :, :M]
    return out.reshape(N, To, Ho, Wo, C)


# -----------------------------------------------------------------------------
# TF-style SAME padding + patch extraction glue (matches Unit3D / MaxPool SAME)
# -----------------------------------------------------------------------------
def _same_pad_1d(size, k, s):
    if size % s == 0:
        pad = max(k - s, 0)
    else:
        pad = max(k - (size % s), 0)
    return pad // 2, pad - pad // 2


def _pad_same_5d(x, ksize, stride):
    _, T, H, W, _ = x.shape
    pt = _same_pad_1d(T, ksize[0], stride[0])
    ph = _same_pad_1d(H, ksize[1], stride[1])
    pw = _same_pad_1d(W, ksize[2], stride[2])
    if pt == (0, 0) and ph == (0, 0) and pw == (0, 0):
        return x
    return jnp.pad(x, ((0, 0), pt, ph, pw, (0, 0)))


def _spatial_patches(xp, ks, st):
    """Per-frame 2D im2col: (N, Tp, Hp, Wp, C) -> (N, Tp, Ho*Wo, kh*kw*C)."""
    kh, kw = ks
    sh, sw = st
    N, Tp, Hp, Wp, C = xp.shape
    Ho = (Hp - kh) // sh + 1
    Wo = (Wp - kw) // sw + 1
    slabs = []
    for dy in range(kh):
        for dx in range(kw):
            slabs.append(xp[:, :, dy:dy + (Ho - 1) * sh + 1:sh,
                            dx:dx + (Wo - 1) * sw + 1:sw, :])
    p = jnp.stack(slabs, axis=4)           # (N, Tp, Ho, Wo, kh*kw, C)
    return p.reshape(N, Tp, Ho * Wo, kh * kw * C)


def _full_patches(xp, ks, st):
    """Full 3D im2col (only for tiny feature maps): -> (N*To*Ho*Wo, taps*C)."""
    kd, kh, kw = ks
    sd, sh, sw = st
    N, Tp, Hp, Wp, C = xp.shape
    To = (Tp - kd) // sd + 1
    Ho = (Hp - kh) // sh + 1
    Wo = (Wp - kw) // sw + 1
    slabs = []
    for dz in range(kd):
        for dy in range(kh):
            for dx in range(kw):
                slabs.append(xp[:, dz:dz + (To - 1) * sd + 1:sd,
                                dy:dy + (Ho - 1) * sh + 1:sh,
                                dx:dx + (Wo - 1) * sw + 1:sw, :])
    p = jnp.stack(slabs, axis=4)           # (N, To, Ho, Wo, taps, C)
    return p.reshape(N * To * Ho * Wo, kd * kh * kw * C)


# -----------------------------------------------------------------------------
# I3D building blocks
# -----------------------------------------------------------------------------
def unit3d_apply(x, unit, stride=(1, 1, 1), relu=True):
    """Unit3D = conv3d (TF-SAME) + folded BN + ReLU.  x: (N, T, H, W, Cin_pad)."""
    kd, kh, kw = unit["ksize"]
    sd, sh, sw = stride
    w, bias = unit["w"], unit["bias"]
    cout_p = w.shape[-1]
    N, T, H, W, C = x.shape
    if (kd, kh, kw) == (1, 1, 1) and stride == (1, 1, 1):
        a = x.reshape(1, 1, N * T * H * W, C)          # batch folded into M
        y = conv_matmul(a, w, bias, relu=relu)
        return y.reshape(N, T, H, W, cout_p)
    xp = _pad_same_5d(x, (kd, kh, kw), stride)
    _, Tp, Hp, Wp, _ = xp.shape
    To = (Tp - kd) // sd + 1
    Ho = (Hp - kh) // sh + 1
    Wo = (Wp - kw) // sw + 1
    if Ho * Wo >= _FUSE_T_MIN_M:
        # Temporally-fused path: spatial im2col only, kd taps on the grid.
        patches = _spatial_patches(xp, (kh, kw), (sh, sw))
        y = conv_matmul(patches, w, bias, relu=relu, t_stride=sd)
    else:
        # Tiny spatial extent: fold every output position into M so the MXU
        # still sees a tall LHS (full 3D im2col is cheap here).
        patches = _full_patches(xp, (kd, kh, kw), (sd, sh, sw))
        a = patches.reshape(1, 1, N * To * Ho * Wo, patches.shape[-1])
        wf = w.reshape(1, kd * w.shape[1], cout_p)
        y = conv_matmul(a, wf, bias, relu=relu)
    return y.reshape(N, To, Ho, Wo, cout_p)


def inception_apply(x, p):
    N, T, H, W, C = x.shape
    trio = p["trio"]
    # The three 1x1 branches (b0, b1a, b2a) share the same input -> one matmul.
    a = x.reshape(1, 1, N * T * H * W, C)
    y = conv_matmul(a, trio["w"], trio["bias"], relu=True)
    y = y.reshape(N, T, H, W, y.shape[-1])
    c0p, c1ap = trio["splits"][0][1], trio["splits"][1][1]
    b0 = y[..., :c0p]
    b1 = unit3d_apply(y[..., c0p:c0p + c1ap], p["b1b"])
    b2 = unit3d_apply(y[..., c0p + c1ap:], p["b2b"])
    b3 = unit3d_apply(pool3d(x, (3, 3, 3), (1, 1, 1), "max", True), p["b3"])
    return jnp.concatenate([b0, b1, b2, b3], axis=-1)


def avgpool3d_valid(x, ksize):
    _, T, H, W, _ = x.shape
    # TODO(synk): reference uses a fixed AvgPool3d([2, 7, 7]); the kernel is
    # clipped to the feature extent so sub-224x224 test clips stay runnable
    # (identical behaviour at the real 224x224/16-frame input size).
    k = (min(ksize[0], T), min(ksize[1], H), min(ksize[2], W))
    return pool3d(x, k, (1, 1, 1), "mean", same_pad=False)


# -----------------------------------------------------------------------------
# Parameter init (synthetic — the original loads rgb_imagenet.pt) and prep.
# -----------------------------------------------------------------------------
_INCEPTION_CFG = [
    ("Mixed_3b", 192, (64, 96, 128, 16, 32, 32)),
    ("Mixed_3c", 256, (128, 128, 192, 32, 96, 64)),
    ("Mixed_4b", 480, (192, 96, 208, 16, 48, 64)),
    ("Mixed_4c", 512, (160, 112, 224, 24, 64, 64)),
    ("Mixed_4d", 512, (128, 128, 256, 24, 64, 64)),
    ("Mixed_4e", 512, (112, 144, 288, 32, 64, 64)),
    ("Mixed_4f", 528, (256, 160, 320, 32, 128, 128)),
    ("Mixed_5b", 832, (256, 160, 320, 32, 128, 128)),
    ("Mixed_5c", 832, (384, 192, 384, 48, 128, 128)),
]


class _KeyGen:
    def __init__(self, seed):
        self._key = jax.random.PRNGKey(seed)

    def __call__(self):
        self._key, sub = jax.random.split(self._key)
        return sub


def _init_unit(kg, cin, cout, ksize, use_bn=True, use_bias=False):
    kd, kh, kw = ksize
    fan_in = cin * kd * kh * kw
    p = {"w": jax.random.normal(kg(), (kd, kh, kw, cin, cout), jnp.float32)
              * jnp.sqrt(2.0 / fan_in)}
    if use_bn:
        p["bn_gamma"] = jnp.ones((cout,), jnp.float32)
        p["bn_beta"] = jnp.zeros((cout,), jnp.float32)
        p["bn_mean"] = jnp.zeros((cout,), jnp.float32)
        p["bn_var"] = jnp.ones((cout,), jnp.float32)
    if use_bias:
        p["b"] = jax.random.normal(kg(), (cout,), jnp.float32) * 0.01
    return p


def _init_inception(kg, cin, c):
    return {
        "b0": _init_unit(kg, cin, c[0], (1, 1, 1)),
        "b1a": _init_unit(kg, cin, c[1], (1, 1, 1)),
        "b1b": _init_unit(kg, c[1], c[2], (3, 3, 3)),
        "b2a": _init_unit(kg, cin, c[3], (1, 1, 1)),
        "b2b": _init_unit(kg, c[3], c[4], (3, 3, 3)),
        "b3": _init_unit(kg, cin, c[5], (1, 1, 1)),
    }


def init_rgb_encoder_raw_params(seed=0, num_classes=400, in_channels=3):
    # TODO(synk): pretrained 'models/rgb_imagenet.pt' weights are replaced by
    # deterministic random init (no checkpoint loading in this synthetic kernel).
    kg = _KeyGen(seed)
    p = {
        "Conv3d_1a_7x7": _init_unit(kg, in_channels, 64, (7, 7, 7)),
        "Conv3d_2b_1x1": _init_unit(kg, 64, 64, (1, 1, 1)),
        "Conv3d_2c_3x3": _init_unit(kg, 64, 192, (3, 3, 3)),
    }
    for name, cin, cfg in _INCEPTION_CFG:
        p[name] = _init_inception(kg, cin, cfg)
    p["Logits"] = _init_unit(kg, 1024, num_classes, (1, 1, 1),
                             use_bn=False, use_bias=True)
    return p


def _fold_unit(p, use_bn):
    """Fold BatchNorm (inference, eps=1e-3) into the conv weight."""
    w = p["w"].astype(jnp.float32)
    kd, kh, kw, cin, cout = w.shape
    wm = w.reshape(kd, kh * kw * cin, cout)
    if use_bn:
        inv = p["bn_gamma"] / jnp.sqrt(p["bn_var"] + 1e-3)
        wm = wm * inv[None, None, :]
        bias = p["bn_beta"] - p["bn_mean"] * inv
    else:
        bias = p.get("b", jnp.zeros((cout,), jnp.float32))
    return wm, bias, (kd, kh, kw), cin, cout


def _expand_unit(p, in_segs, use_bn=True):
    """Fold BN, re-lay the K rows for a 128-padded (possibly concatenated /
    segmented) input channel layout, pad Cout to a multiple of 128.  Done once
    at prep time, so activations flow lane-aligned with no per-layer pads."""
    wm, bias, ksize, cin, cout = _fold_unit(p, use_bn)
    kd, kh, kw = ksize
    khw = kh * kw
    assert sum(r for r, _ in in_segs) == cin
    w4 = wm.reshape(kd, khw, cin, cout)
    pieces, off = [], 0
    for real, padded in in_segs:
        seg = w4[:, :, off:off + real, :]
        if padded > real:
            seg = jnp.pad(seg, ((0, 0), (0, 0), (0, padded - real), (0, 0)))
        pieces.append(seg)
        off += real
    w4 = jnp.concatenate(pieces, axis=2) if len(pieces) > 1 else pieces[0]
    cin_p = sum(pd for _, pd in in_segs)
    cout_p = _round_up(cout, 128)
    K = khw * cin_p
    Kp = _round_up(K, 128)               # only the RGB stem (cin=3) actually pads
    w3 = jnp.pad(w4.reshape(kd, K, cout), ((0, 0), (0, Kp - K), (0, cout_p - cout)))
    bias = jnp.pad(bias, (0, cout_p - cout))
    return {"w": w3.astype(jnp.bfloat16),
            "bias": bias.reshape(1, cout_p).astype(jnp.float32),
            "ksize": ksize, "cout": cout, "cout_p": cout_p}


def _prepare_trio(rp, in_segs):
    ws, bs, splits = [], [], []
    for key in ("b0", "b1a", "b2a"):
        u = _expand_unit(rp[key], in_segs)
        ws.append(u["w"])
        bs.append(u["bias"])
        splits.append((u["cout"], u["cout_p"]))
    return {"w": jnp.concatenate(ws, axis=2),
            "bias": jnp.concatenate(bs, axis=1),
            "splits": splits}


def prepare_params(raw):
    """One-time: fold BN, fuse the Inception 1x1 trios, lay weights out for the
    128-padded channel flow, cast to bf16."""
    prep = {}
    segs = [(3, 3)]                                        # raw RGB input
    for name in ("Conv3d_1a_7x7", "Conv3d_2b_1x1", "Conv3d_2c_3x3"):
        u = _expand_unit(raw[name], segs)
        prep[name] = u
        segs = [(u["cout"], u["cout_p"])]
    for name, _, _ in _INCEPTION_CFG:
        rp = raw[name]
        trio = _prepare_trio(rp, segs)
        b1b = _expand_unit(rp["b1b"], [trio["splits"][1]])
        b2b = _expand_unit(rp["b2b"], [trio["splits"][2]])
        b3 = _expand_unit(rp["b3"], segs)
        prep[name] = {"trio": trio, "b1b": b1b, "b2b": b2b, "b3": b3}
        segs = [trio["splits"][0], (b1b["cout"], b1b["cout_p"]),
                (b2b["cout"], b2b["cout_p"]), (b3["cout"], b3["cout_p"])]
    prep["Logits"] = _expand_unit(raw["Logits"], segs, use_bn=False)
    return prep


# -----------------------------------------------------------------------------
# Full RGBEncoder forward (InceptionI3d, final_endpoint='Logits')
# -----------------------------------------------------------------------------
def rgb_encoder_forward(x, params):
    """x: (N, 3, T, H, W) float32 NCDHW.  Returns (N, num_classes, T_out)."""
    y = jnp.transpose(x, (0, 2, 3, 4, 1)).astype(jnp.bfloat16)   # -> (N,T,H,W,C)
    y = unit3d_apply(y, params["Conv3d_1a_7x7"], stride=(2, 2, 2))
    y = pool3d(y, (1, 3, 3), (1, 2, 2), "max", True)             # MaxPool3d_2a_3x3
    y = unit3d_apply(y, params["Conv3d_2b_1x1"])
    y = unit3d_apply(y, params["Conv3d_2c_3x3"])
    y = pool3d(y, (1, 3, 3), (1, 2, 2), "max", True)             # MaxPool3d_3a_3x3
    y = inception_apply(y, params["Mixed_3b"])
    y = inception_apply(y, params["Mixed_3c"])
    y = pool3d(y, (3, 3, 3), (2, 2, 2), "max", True)             # MaxPool3d_4a_3x3
    for name in ("Mixed_4b", "Mixed_4c", "Mixed_4d", "Mixed_4e", "Mixed_4f"):
        y = inception_apply(y, params[name])
    y = pool3d(y, (2, 2, 2), (2, 2, 2), "max", True)             # MaxPool3d_5a_2x2
    y = inception_apply(y, params["Mixed_5b"])
    y = inception_apply(y, params["Mixed_5c"])
    y = avgpool3d_valid(y, (2, 7, 7))
    # TODO(synk): Dropout(p=0.5) is identity at inference time.
    y = unit3d_apply(y, params["Logits"], relu=False)
    nc = params["Logits"]["cout"]
    logits = y[:, :, 0, 0, :nc]                                   # spatial squeeze
    return jnp.transpose(logits, (0, 2, 1)).astype(jnp.float32)   # (N, classes, T)


if __name__ == "__main__":
    raw = init_rgb_encoder_raw_params(seed=0)
    params = prepare_params(raw)
    # Small deterministic clip: 10 frames at 32x32 exercises every stage of the
    # I3D trunk (both the temporally-fused conv path and the small-map im2col
    # fallback, every pooling kernel) while staying well inside the time budget.
    x = jax.random.normal(jax.random.PRNGKey(0), (1, 3, 10, 32, 32), jnp.float32)
    out = rgb_encoder_forward(x, params)
    out = jax.block_until_ready(out)
    assert out.shape == (1, 400, 1), out.shape
    assert bool(jnp.all(jnp.isfinite(out)))
    print("KERNEL_OK")
</pallas_src>

<mosaic_0001>
module attributes {stable_mosaic.version = 11 : i64} {
  func.func @_conv_mm_kernel(%arg0: i32, %arg1: i32, %arg2: i32, %arg3: i32, %arg4: memref<1x1x256x256xbf16, #tpu.memory_space<vmem>>, %arg5: memref<1x256x128xbf16, #tpu.memory_space<vmem>>, %arg6: memref<1x128xf32, #tpu.memory_space<vmem>>, %arg7: memref<1x1x256x128xbf16, #tpu.memory_space<vmem>>, %arg8: memref<256x128xf32, #tpu.memory_space<vmem>>) attributes {dimension_semantics = [#tpu.dimension_semantics<parallel>, #tpu.dimension_semantics<parallel>, #tpu.dimension_semantics<parallel>, #tpu.dimension_semantics<arbitrary>], iteration_bounds = array<i64: 1, 5, 1, 7>, scalar_prefetch = 0 : i64, scratch_operands = 1 : i64, tpu.core_type = #tpu.core_type<tc>, window_params = [{transform_indices = @transform_0, window_bounds = array<i64: 1, 1, 256, 256>}, {transform_indices = @transform_1, window_bounds = array<i64: 1, 256, 128>}, {pipeline_mode = #tpu.pipeline_mode<synchronous>, transform_indices = @transform_2, window_bounds = array<i64: 1, 128>}, {transform_indices = @transform_3, window_bounds = array<i64: 1, 1, 256, 128>}]} {
    %c0_i32 = arith.constant 0 : i32
    %0 = arith.cmpi eq, %arg3, %c0_i32 : i32
    %1 = arith.extui %0 : i1 to i32
    %c0_i32_0 = arith.constant 0 : i32
    %2 = arith.cmpi ne, %1, %c0_i32_0 : i32
    scf.if %2 {
      %cst_12 = arith.constant 0.000000e+00 : f32
      %14 = vector.broadcast %cst_12 : f32 to vector<256x128xf32>
      %c0_13 = arith.constant 0 : index
      %c0_14 = arith.constant 0 : index
      %15 = vector.load %arg8[%c0_13, %c0_14] : memref<256x128xf32, #tpu.memory_space<vmem>>, vector<256x128xf32>
      tpu.vector_store %arg8[%c0_13, %c0_14], %14 {strides = array<i32>} : memref<256x128xf32, #tpu.memory_space<vmem>>, vector<256x128xf32>,
    } else {
    }
    %c0 = arith.constant 0 : index
    %c0_1 = arith.constant 0 : index
    %3 = vector.load %arg8[%c0, %c0_1] : memref<256x128xf32, #tpu.memory_space<vmem>>, vector<256x128xf32>
    %c0_2 = arith.constant 0 : index
    %c0_3 = arith.constant 0 : index
    %c0_4 = arith.constant 0 : index
    %c0_5 = arith.constant 0 : index
    %4 = vector.load %arg4[%c0_2, %c0_3, %c0_4, %c0_5] : memref<1x1x256x256xbf16, #tpu.memory_space<vmem>>, vector<1x1x256x256xbf16>
    %5 = vector.shape_cast %4 : vector<1x1x256x256xbf16> to vector<256x256xbf16>
    %c0_6 = arith.constant 0 : index
    %c0_7 = arith.constant 0 : index
    %c0_8 = arith.constant 0 : index
    %6 = vector.load %arg5[%c0_6, %c0_7, %c0_8] : memref<1x256x128xbf16, #tpu.memory_space<vmem>>, vector<1x256x128xbf16>
    %7 = vector.shape_cast %6 : vector<1x256x128xbf16> to vector<256x128xbf16>
    %cst = arith.constant dense<0.000000e+00> : vector<256x128xf32>
    %8 = tpu.matmul %5, %7, %cst {dimension_numbers = #tpu.dot_dimension_numbers<[1], [0], [0], [1], [0, 0, 1, 1], [], []>} : vector<256x256xbf16>, vector<256x128xbf16>, vector<256x128xf32> -> vector<256x128xf32>
    %9 = arith.addf %3, %8 : vector<256x128xf32>
    %c0_9 = arith.constant 0 : index
    %c0_10 = arith.constant 0 : index
    %10 = vector.load %arg8[%c0_9, %c0_10] : memref<256x128xf32, #tpu.memory_space<vmem>>, vector<256x128xf32>
    tpu.vector_store %arg8[%c0_9, %c0_10], %9 {strides = array<i32>} : memref<256x128xf32, #tpu.memory_space<vmem>>, vector<256x128xf32>,
    %c6_i32 = arith.constant 6 : i32
    %11 = arith.cmpi eq, %arg3, %c6_i32 : i32
    %12 = arith.extui %11 : i1 to i32
    %c0_i32_11 = arith.constant 0 : i32
    %13 = arith.cmpi ne, %12, %c0_i32_11 : i32
    scf.if %13 {
      %c0_12 = arith.constant 0 : index
      %c0_13 = arith.constant 0 : index
      %14 = vector.load %arg8[%c0_12, %c0_13] : memref<256x128xf32, #tpu.memory_space<vmem>>, vector<256x128xf32>
      %c0_14 = arith.constant 0 : index
      %c0_15 = arith.constant 0 : index
      %15 = vector.load %arg6[%c0_14, %c0_15] : memref<1x128xf32, #tpu.memory_space<vmem>>, vector<1x128xf32>
      %16 = vector.broadcast %15 : vector<1x128xf32> to vector<256x128xf32>
      %17 = arith.addf %14, %16 : vector<256x128xf32>
      %cst_16 = arith.constant 0.000000e+00 : f32
      %18 = vector.broadcast %cst_16 : f32 to vector<256x128xf32>
      %19 = arith.maximumf %17, %18 : vector<256x128xf32>
      %20 = arith.truncf %19 : vector<256x128xf32> to vector<256x128xbf16>
      %c0_17 = arith.constant 0 : index
      %c0_18 = arith.constant 0 : index
      %c0_19 = arith.constant 0 : index
      %c0_20 = arith.constant 0 : index
      %21 = vector.load %arg7[%c0_17, %c0_18, %c0_19, %c0_20] : memref<1x1x256x128xbf16, #tpu.memory_space<vmem>>, vector<1x1x256x128xbf16>
      %22 = vector.shape_cast %21 : vector<1x1x256x128xbf16> to vector<256x128xbf16>
      %23 = vector.shape_cast %20 : vector<256x128xbf16> to vector<1x1x256x128xbf16>
      tpu.vector_store %arg7[%c0_17, %c0_18, %c0_19, %c0_20], %23 {strides = array<i32>} : memref<1x1x256x128xbf16, #tpu.memory_space<vmem>>, vector<1x1x256x128xbf16>,
    } else {
    }
    return
  }
  func.func @transform_0(%arg0: i32, %arg1: i32, %arg2: i32, %arg3: i32) -> (i32, i32, i32, i32) {
    %c2_i32 = arith.constant 2 : i32
    %0 = arith.muli %arg1, %c2_i32 : i32
    %1 = arith.addi %0, %arg3 : i32
    %c0_i32 = arith.constant 0 : i32
    %c0_i32_0 = arith.constant 0 : i32
    return %arg0, %1, %arg2, %c0_i32 : i32, i32, i32, i32
  }
  func.func @transform_1(%arg0: i32, %arg1: i32, %arg2: i32, %arg3: i32) -> (i32, i32, i32) {
    %c0_i32 = arith.constant 0 : i32
    %c0_i32_0 = arith.constant 0 : i32
    %c0_i32_1 = arith.constant 0 : i32
    return %arg3, %c0_i32, %c0_i32_0 : i32, i32, i32
  }
  func.func @transform_2(%arg0: i32, %arg1: i32, %arg2: i32, %arg3: i32) -> (i32, i32) {
    %c0_i32 = arith.constant 0 : i32
    %c0_i32_0 = arith.constant 0 : i32
    %c0_i32_1 = arith.constant 0 : i32
    return %c0_i32, %c0_i32_0 : i32, i32
  }
  func.func @transform_3(%arg0: i32, %arg1: i32, %arg2: i32, %arg3: i32) -> (i32, i32, i32, i32) {
    %c0_i32 = arith.constant 0 : i32
    %c0_i32_0 = arith.constant 0 : i32
    return %arg0, %arg1, %arg2, %c0_i32 : i32, i32, i32, i32
  }
}

</mosaic_0001>

<bundles_post_ra>
// kernel: tpu_custom_call.1
= control target key start
LH: loop header
LB: loop body
LE: loop exit
PB: predicated region body
PF: predicated region fallthrough
CT: control target
= control target key end

     0   :  { %s2574_s0 = inlined_call_operand.hbm [shape: bf16[1,15,256,256], index: 0, kind: input, shape index: {}]   ;;  %s2575_s1 = inlined_call_operand.hbm [shape: bf16[7,256,128], index: 1, kind: input, shape index: {}]   ;;  %s2576_s2 = inlined_call_operand.hbm [shape: f32[1,128], index: 2, kind: input, shape index: {}]   ;;  %s2577_s3 = inlined_call_operand.hbm [shape: bf16[1,5,256,128], index: 3, kind: output, shape index: {}]  }
   0x1   :  { %2598 = sst [smem:[#allocation26_spill]] %s2574_s0 }
   0x2   :  { %2599 = sst [smem:[#allocation27_spill]] %s2576_s2 }
   0x3   :  { %2600 = sst [smem:[#allocation28_spill]] %s2577_s3 }
   0x4   :  { %8 = vsyncpa [#allocation4], 0 }
   0x5   :  { %10 = vsyncpa [#allocation4 + $0x1], 0 }
   0x6   :  { %11 = vsyncpa [#allocation7], 0 }
   0x7   :  { %13 = vsyncpa [#allocation7 + $0x1], 0 }
   0x8   :  { %14 = vsyncpa [#allocation5], 0 }
   0x9   :  { %16 = vsyncpa [#allocation5 + $0x1], 0  ;;  %s2168_s12 = smov 0   ;;  %s2170_s13 = smov 0  }
   0xa   :  { %s2172_s14 = smov 0   ;;  %s2174_s15 = smov 0  }
   0xb   :  { %s2176_s16 = smov 0   ;;  %s2178_s17 = smov 0  }
   0xc   :  { %s2180_s18 = smov 0   ;;  %s2182_s19 = smov 0  }
   0xd   :  { %s2184_s20 = smov 0   ;;  %s2186_s21 = smov 0  }
   0xe   :  { %s2188_s22 = smov 0   ;;  %s2190_s23 = smov 0  }
   0xf   :  { %s2192_s24 = smov 0   ;;  %s2194_s25 = smov 0  }
  0x10 LB: > { %2601 = sst [smem:[#allocation14_spill]] %s2083_s12  ;;  %s2235_s26 = sadd.s32 4294967295, %s2135_s25   ;;  %s2135_s25 = sphi %s2194_s25, %s22_s25   ;;  %s2131_s24 = sphi %s2192_s24, %s2662_s24   ;;  %s2127_s23 = sphi %s2190_s23, %s2661_s23   ;;  %s2123_s22 = sphi %s2188_s22, %s2660_s22   ;;  %s2119_s21 = sphi %s2186_s21, %s2659_s21   ;;  %s2115_s20 = sphi %s2184_s20, %s2658_s20   ;;  %s2111_s19 = sphi %s2182_s19, %s2657_s19   ;;  %s2107_s18 = sphi %s2180_s18, %s2656_s18   ;;  %s2103_s17 = sphi %s2178_s17, %s2655_s17   ;;  %s2099_s16 = sphi %s2176_s16, %s2654_s16   ;;  %s2095_s15 = sphi %s2174_s15, %s2647_s15   ;;  %s2091_s14 = sphi %s2172_s14, %s2653_s14   ;;  %s2087_s13 = sphi %s2170_s13, %s2652_s13   ;;  %s2083_s12 = sphi %s2168_s12, %s2646_s12  }
  0x11   : > { %2602 = sst [smem:[#allocation15_spill]] %s2087_s13  ;;  %s1324_s27 = sadd.s32 4294967294, %s2135_s25  }
  0x12   : > { %2603 = sst [smem:[#allocation16_spill]] %s2099_s16  ;;  %p2578_p0 = scmp.eq.s32.totalorder %s2135_s25, 0 }
  0x13   : > { %2604 = sst [smem:[#allocation17_spill]] %s2119_s21  ;;  %p76_p1 = scmp.ne.s32.totalorder %s2111_s19, %s2107_s18 }
  0x14   : > { %2605 = sst [smem:[#allocation18_spill]] %s2123_s22  ;;  %p77_p2 = scmp.eq.s32.totalorder %s2235_s26, 0 }
  0x15   : > { %2606 = sst [smem:[#allocation19_spill]] %s2235_s26  ;;  %p96_p3 = scmp.ne.s32.totalorder %s2103_s17, %s2099_s16 }
  0x16   : > { %p102_p4 = scmp.ne.s32.totalorder %s2099_s16, %s2095_s15  ;;  %p2247_p5 = por %p77_p2, %p76_p1 }
  0x17   : > { %p2254_p6 = por %p96_p3, %p2578_p0  ;;  %p150_p8 = scmp.ne.s32.totalorder %s2091_s14, %s2087_s13 }
  0x18   : > { %s2607_s29 = scalar_select %p2247_p5, 1, 0 }
  0x19   : > { %p2260_p7 = por %p102_p4, %p77_p2  ;;  %p151_p9 = scmp.eq.s32.totalorder %s2235_s26, 34 }
  0x1a   : > { %2608 = sst [smem:[#allocation20_spill]] %s2607_s29  ;;  %p156_p10 = scmp.ne.s32.totalorder %s2087_s13, %s2083_s12 }
  0x1b   : > { %s2610_s5 = scalar_select %p2260_p7, 1, 0 }
  0x1c   : > { %p157_p11 = scmp.eq.s32.totalorder %s1324_s27, 34  ;;  %p2269_p12 = por %p151_p9, %p150_p8 }
  0x1d   : > { %2611 = sst [smem:[#allocation21_spill]] %s2610_s5  ;;  %p1327_p13 = scmp.ge.s32.totalorder %s2135_s25, 1 }
  0x1e   : > { %s2612_s6 = scalar_select %p2269_p12, 1, 0 }
  0x1f   : > { %p2274_p1 = por %p157_p11, %p156_p10  ;;  %p164_p3 = scmp.lt.s32.totalorder %s2135_s25, 36 }
  0x20   : > { %2613 = sst [smem:[#allocation22_spill]] %s2612_s6  ;;  %s2137_s9 = smov [#allocation8]  }
  0x21   : > { %s2614_s7 = scalar_select %p2274_p1, 1, 0 }
  0x22   : > { %p2279_p4 = pnand %p1327_p13, %p164_p3  ;;  %s177_s10 = sshll.u32 %s2137_s9, 4  ;;  %s178_s10 = int_to_ptr.vmem [resolvable:$true] %s177_s10 }
  0x23   : > { %2615 = sst [smem:[#allocation23_spill]] %s2614_s7  ;;  %p1714_p8 = scmp.lt.s32.totalorder %s2135_s25, 35 }
  0x24   : > { %s2616_s8 = scalar_select %p2279_p4, 1, 0 }
  0x25   : > { %p1698_p0 = pneg %p2279_p4  ;;  %p2292_p10 = pnand %p1714_p8, %p2254_p6 }
  0x26   : > { %s1912_s15 = scalar_lea.vmem %s178_s10, 16  ;;  %s1919_s18 = scalar_lea.vmem %s178_s10, 32 }
  0x27   : > { %p1699_p9 = pnand %p1698_p0, %p77_p2  ;;  %p1913_p13 = scmp.ne.s32.totalorder %s178_s10, %s1912_s15 }
  0x28   : > { %p1920_p12 = scmp.lt.s32.totalorder %s178_s10, %s178_s10  ;;  %p1921_p7 = scmp.lt.s32.totalorder %s1919_s18, %s1912_s15 }
  0x29   : > { %p1903_p11 = pneg %p1699_p9 }
  0x2a   : > { %p1922_p5 = por %p1921_p7, %p1920_p12 }
  0x2b   : > { %p1915_p3 = pnand %p1913_p13, %p1903_p11 }
  0x2d   : > { %p1916_p1 = pneg %p1915_p3 }
  0x2f   : > { %p1923_p4 = pnand %p1922_p5, %p1916_p1 }
  0x31   : > { %1926 = shalt.err (!%p1923_p4)
}
  0x32   : > { %s2618_s2 = sld [smem:[#allocation27_spill]]  ;;  %s37_s4 = sadd.s32 1, %s2127_s23 }
  0x33   : > { %s44_s15 = sadd.s32 1, %s2131_s24  ;;  %p38_p0 = scmp.ge.s32.totalorder %s37_s4, 7 }
  0x34   : > { %s1325_s18 = sshll.u32 %s2131_s24, 1  ;;  %s63_s9 = sadd.s32 1, %s2115_s20 }
  0x35   : > { %s53_s27 = sadd.s32 %s2127_s23, %s1325_s18  ;;  %s2664_s4 = smov (%p38_p0, %s37_s4), 0 }
  0x36   : > { %s2666_s15 = smov (!%p38_p0, %s44_s15), %s2131_s24  ;;  %p70_p5 = scmp.ne.s32.totalorder %s2115_s20, %s2111_s19 }
  0x37   : > { %s86_s30 = ssub.s32 %s2127_s23, %s2664_s4  ;;  %p46_p6 = scmp.ge.s32.totalorder %s2666_s15, 5 }
  0x38   : > { %1701 = dma.hbm_to_vmem [thread:$0]  (!%p1699_p9), %s2618_s2, 16, %s178_s10, [#allocation7]  }
  0x39   : > { %p87_p7 = scmp.eq.s32.totalorder %s86_s30, 0  ;;  %p2619_p12 = scmp.eq.s32.totalorder %s2135_s25, 0 }
  0x3a   : > { %s188_s28 = sand.u32 1, %s2115_s20   ;;  %s2668_s15 = smov (%p46_p6, %s2666_s15), 0 }
  0x3b   : > { %p2313_p1 = por %p2619_p12, %p70_p5  ;;  %2621 = sst [smem:[#allocation24_spill]] %s2668_s15 }
  0x3c   : > { %s2622_s18 = sadd.s32 1, %s2103_s17  ;;  %s1326_s7 = sshll.u32 %s2668_s15, 1 }
  0x3d   : > { %s2323_s2 = scalar_select %p87_p7, %s2103_s17, %s2622_s18  }
  0x3e   : > { %s134_s12 = ssub.s32 %s2131_s24, %s2668_s15  ;;  %s55_s3 = sadd.s32 %s1326_s7, %s2664_s4 }
  0x3f   : > { %2623 = sst [smem:[#allocation25_spill]] %s2323_s2  ;;  %p138_p4 = scmp.eq.s32.totalorder %s134_s12, 0 }
  0x40   : > { %s57_s30 = ssub.s32 %s53_s27, %s55_s3  ;;  %s1330_s6 = sshll.u32 %s188_s28, 8 }
  0x41   : > { %p61_p9 = scmp.eq.s32.totalorder %s57_s30, 0  ;;  %s2624_s22 = sadd.s32 1, %s2091_s14 }
  0x42   : > { %s2332_s21 = scalar_select %p138_p4, %s2091_s14, %s2624_s22  }
  0x43   : > { %s2335_s13 = scalar_select %p61_p9, %s2115_s20, %s63_s9  }
  0x44   : > { %s1430_s5 = sshll.u32 %s53_s27, 12  ;;  %s2625_s0 = sld [smem:[#allocation26_spill]] }
  0x45   : > { %s192_s18 = scalar_lea.vmem [#allocation3], %s1330_s6  ;;  %p2344_p11 = pnand %p1714_p8, %p2313_p1 }
  0x46   : > { %s206_s2 = sshll.u32 %s192_s18, 4  ;;  %s216_s3 = sand.u32 1, %s2135_s25   ;;  %s207_s2 = int_to_ptr.vmem [resolvable:$true] %s206_s2 }
  0x47   : > { %s189_s22 = scalar_lea.sflag [#allocation4], %s188_s28  ;;  %p1929_p13 = pneg %p2344_p11 }
  0x48   : > { %s1940_s7 = scalar_lea.vmem %s207_s2, 4096  ;;  %s2138_s16 = smov [#allocation3]  }
  0x49   : > { %p1941_p3 = scmp.ne.s32.totalorder %s207_s2, %s1940_s7  ;;  %s1945_s26 = sshll.u32 %s2138_s16, 4  ;;  %s1946_s26 = int_to_ptr.vmem [resolvable:$false] %s1945_s26 }
  0x4a   : > { %s205_s29 = scalar_lea.hbm %s2625_s0, %s1430_s5  ;;  %s1947_s5 = scalar_lea.vmem %s1946_s26, 8192 }
  0x4b   : > { %p1943_p0 = pnand %p1941_p3, %p1929_p13  ;;  %p1948_p6 = scmp.lt.s32.totalorder %s207_s2, %s1946_s26 }
  0x4c   : > { %p1949_p7 = scmp.lt.s32.totalorder %s1947_s5, %s1940_s7 }
  0x4d   : > { %p1944_p5 = pneg %p1943_p0 }
  0x4e   : > { %p1950_p12 = por %p1949_p7, %p1948_p6 }
  0x50   : > { %p1951_p8 = pnand %p1950_p12, %p1944_p5 }
  0x52   : > { %1954 = shalt.err (!%p1951_p8)
}
  0x53   : > { %s2139_s6 = smov 128   ;;  %s2140_s28 = smov 8  }
  0x54   : > { %1705 = dma.hbm_to_vmem [thread:$0]  (!%p2344_p11), %s205_s29, 4096, %s207_s2, %s189_s22, %s2139_s6, %s2139_s6, %s2140_s28  }
  0x55   : > { %s218_s27 = sand.u32 1, %s2103_s17   ;;  %s1431_s10 = sshll.u32 %s2127_s23, 11 }
  0x56   : > { %s1334_s9 = sshll.u32 %s218_s27, 7  ;;  %s226_s16 = scalar_lea.hbm %s2575_s1, %s1431_s10 }
  0x57   : > { %s220_s26 = scalar_lea.vmem [#allocation6], %s1334_s9  ;;  %s217_s5 = scalar_lea.sflag [#allocation7], %s216_s3 }
  0x58   : > { %s227_s7 = sshll.u32 %s220_s26, 4  ;;  %p1957_p1 = pneg %p2292_p10  ;;  %s228_s7 = int_to_ptr.vmem [resolvable:$true] %s227_s7 }
  0x59   : > { %s1968_s0 = scalar_lea.vmem %s228_s7, 2048  ;;  %s2141_s15 = smov [#allocation6]  }
  0x5a   : > { %p1969_p4 = scmp.ne.s32.totalorder %s228_s7, %s1968_s0  ;;  %s1973_s12 = sshll.u32 %s2141_s15, 4  ;;  %s1974_s12 = int_to_ptr.vmem [resolvable:$false] %s1973_s12 }
  0x5b   : > { %s1975_s2 = scalar_lea.vmem %s1974_s12, 4096  ;;  %p1976_p11 = scmp.lt.s32.totalorder %s228_s7, %s1974_s12 }
  0x5c   : > { %p1971_p9 = pnand %p1969_p4, %p1957_p1  ;;  %p1977_p3 = scmp.lt.s32.totalorder %s1975_s2, %s1968_s0 }
  0x5e   : > { %p1972_p13 = pneg %p1971_p9  ;;  %p1978_p0 = por %p1977_p3, %p1976_p11 }
  0x60   : > { %p1979_p5 = pnand %p1978_p0, %p1972_p13 }
  0x62   : > { %1982 = shalt.err (!%p1979_p5)
}
  0x63   : > { %s2142_s29 = smov 64   ;;  %s2143_s22 = smov 4  }
  0x64   : > { %1708 = dma.hbm_to_vmem [thread:$0]  (!%p2292_p10), %s226_s16, 2048, %s228_s7, %s217_s5, %s2142_s29, %s2142_s29, %s2143_s22  }
  0x65   : > { %p2627_p6 = scmp.ne.s32.totalorder %s2616_s8, 0 }
  0x66   : > { %s2628_s3 = sld [smem:[#allocation20_spill]] (!%p2627_p6)  ;;  %s241_s6 = sand.u32 (!%p2627_p6), 1, %s2111_s19  }
  0x67   : > { %239 = sbr.rel (%p2627_p6) target bundleno = 502 (0x1f6), region = 32  ;;  %s1338_s28 = sshll.u32 (!%p2627_p6), %s241_s6, 8 }
  0x68   : > { %s242_s15 = scalar_lea.sflag (!%p2627_p6), [#allocation4], %s241_s6  ;;  %s2365_s27 = scalar_lea.vmem (!%p2627_p6), [#allocation3], %s1338_s28 }
  0x6c   : > { %p2629_p7 = scmp.ne.s32.totalorder %s2628_s3, 0 }
  0x6e   : > { %2066 = dma.done.wait (%p2629_p7), %s242_s15, 4096  }
  0x6f   : > { %2068 = vsyncadd (%p2629_p7), %s242_s15, 4294963200  ;;  %s2630_s0 = sld [smem:[#allocation19_spill]] }
  0x70   : > { %s2631_s9 = sld [smem:[#allocation16_spill]] }
  0x71   : > { %s2632_s10 = sld [smem:[#allocation21_spill]] }
  0x75   : > { %s250_s11 = sand.u32 1, %s2630_s0  }
  0x76   : > { %s252_s30 = sand.u32 1, %s2631_s9   ;;  %s251_s8 = scalar_lea.sflag [#allocation7], %s250_s11 }
  0x77   : > { %s1339_s18 = sshll.u32 %s252_s30, 7  ;;  %p2633_p10 = scmp.ne.s32.totalorder %s2632_s10, 0 }
  0x78   : > { %s2373_s16 = scalar_lea.vmem [#allocation6], %s1339_s18 }
  0x79   : > { %2070 = dma.done.wait (%p2633_p10), %s251_s8, 2048  }
  0x7a   : > { %2072 = vsyncadd (%p2633_p10), %s251_s8, 4294965248 }
  0x7b   : > { %2074 = dma.done.wait (%p77_p2), [#allocation7], 16  }
  0x7c   : > { %2076 = vsyncadd (%p77_p2), [#allocation7], 4294967280  ;;  %s2634_s26 = sld [smem:[#allocation15_spill]] }
  0x7d   : > { %s2635_s2 = sld [smem:[#allocation17_spill]] }
  0x82   : > { %s283_s7 = sand.u32 1, %s2634_s26  }
  0x83   : > { %s1341_s5 = sshll.u32 %s283_s7, 7  ;;  %p1342_p12 = scmp.ne.s32.totalorder %s2635_s2, 0 }
  0x84   : > { %s2386_s12 = scalar_lea.vmem [#allocation9], %s1341_s5 }
  0x85   : > { %294 = sbr.rel (%p1342_p12) target bundleno = 155 (0x9b), region = 48 }
  0x8a   : > { %v2144_v0 = vmov 0.0  }
  0x8b   : > { %295 = vst [vmem:[#allocation2 + $0xb0] sm:$0xff] %v2144_v0  ;;  %296 = vst [vmem:[#allocation2] sm:$0xff] %v2144_v0 }
  0x8c   : > { %297 = vst [vmem:[#allocation2 + $0xd8] sm:$0xff] %v2144_v0  ;;  %298 = vst [vmem:[#allocation2 + $0x18] sm:$0xff] %v2144_v0 }
  0x8d   : > { %299 = vst [vmem:[#allocation2 + $0x50] sm:$0xff] %v2144_v0  ;;  %300 = vst [vmem:[#allocation2 + $0x68] sm:$0xff] %v2144_v0 }
  0x8e   : > { %301 = vst [vmem:[#allocation2 + $0x30] sm:$0xff] %v2144_v0  ;;  %302 = vst [vmem:[#allocation2 + $0x48] sm:$0xff] %v2144_v0 }
  0x8f   : > { %303 = vst [vmem:[#allocation2 + $0x80] sm:$0xff] %v2144_v0  ;;  %304 = vst [vmem:[#allocation2 + $0x88] sm:$0xff] %v2144_v0 }
  0x90   : > { %305 = vst [vmem:[#allocation2 + $0xe8] sm:$0xff] %v2144_v0  ;;  %306 = vst [vmem:[#allocation2 + $0xb8] sm:$0xff] %v2144_v0 }
  0x91   : > { %307 = vst [vmem:[#allocation2 + $0x60] sm:$0xff] %v2144_v0  ;;  %308 = vst [vmem:[#allocation2 + $0xf0] sm:$0xff] %v2144_v0 }
  0x92   : > { %309 = vst [vmem:[#allocation2 + $0x8] sm:$0xff] %v2144_v0  ;;  %310 = vst [vmem:[#allocation2 + $0x78] sm:$0xff] %v2144_v0 }
  0x93   : > { %311 = vst [vmem:[#allocation2 + $0x38] sm:$0xff] %v2144_v0  ;;  %312 = vst [vmem:[#allocation2 + $0x58] sm:$0xff] %v2144_v0 }
  0x94   : > { %313 = vst [vmem:[#allocation2 + $0x40] sm:$0xff] %v2144_v0  ;;  %314 = vst [vmem:[#allocation2 + $0xc8] sm:$0xff] %v2144_v0 }
  0x95   : > { %315 = vst [vmem:[#allocation2 + $0xe0] sm:$0xff] %v2144_v0  ;;  %316 = vst [vmem:[#allocation2 + $0x90] sm:$0xff] %v2144_v0 }
  0x96   : > { %317 = vst [vmem:[#allocation2 + $0x70] sm:$0xff] %v2144_v0  ;;  %318 = vst [vmem:[#allocation2 + $0xc0] sm:$0xff] %v2144_v0 }
  0x97   : > { %319 = vst [vmem:[#allocation2 + $0xa8] sm:$0xff] %v2144_v0  ;;  %320 = vst [vmem:[#allocation2 + $0xd0] sm:$0xff] %v2144_v0 }
  0x98   : > { %321 = vst [vmem:[#allocation2 + $0x10] sm:$0xff] %v2144_v0  ;;  %322 = vst [vmem:[#allocation2 + $0x28] sm:$0xff] %v2144_v0 }
  0x99   : > { %323 = vst [vmem:[#allocation2 + $0xa0] sm:$0xff] %v2144_v0  ;;  %324 = vst [vmem:[#allocation2 + $0xf8] sm:$0xff] %v2144_v0 }
  0x9a   : > { %325 = vst [vmem:[#allocation2 + $0x20] sm:$0xff] %v2144_v0  ;;  %326 = vst [vmem:[#allocation2 + $0x98] sm:$0xff] %v2144_v0 }
  0x9b PF: > { %v1837_v1 = vld [vmem:[%s2373_s16 + $0x78] sm:$0xff]   ;;  %v1839_v3 = vld [vmem:[%s2373_s16 + $0x70] sm:$0xff]   ;;  %v1841_v5 = vld [vmem:[%s2373_s16 + $0x68] sm:$0xff]   ;;  %s2636_s29 = sld [smem:[#allocation17_spill]] }
  0x9c   : > { %v1838_v2 = vld [vmem:[%s2373_s16 + $0x38] sm:$0xff]   ;;  %1560 = vmatprep.subr.bf16.mxu0 %v1837_v1  ;;  %1672 = vmatprep.subr.bf16.mxu1 %v1837_v1  ;;  %v1840_v4 = vld [vmem:[%s2373_s16 + $0x30] sm:$0xff]   ;;  %v1842_v6 = vld [vmem:[%s2373_s16 + $0x28] sm:$0xff]  }
  0x9d   : > { %1561 = vmatpush3.bf16.msra.mxu0 %v1838_v2  ;;  %1680 = vmatpush3.bf16.msra.mxu1 %v1838_v2  ;;  %v1843_v7 = vld [vmem:[%s2373_s16 + $0x60] sm:$0xff]   ;;  %v1845_v9 = vld [vmem:[%s2373_s16 + $0x58] sm:$0xff]   ;;  %v1847_v11 = vld [vmem:[%s2373_s16 + $0x50] sm:$0xff]  }
  0x9e   : > { %1562 = vmatprep.subr.bf16.mxu0 %v1839_v3  ;;  %1673 = vmatprep.subr.bf16.mxu1 %v1839_v3  ;;  %v1844_v8 = vld [vmem:[%s2373_s16 + $0x20] sm:$0xff]   ;;  %v1846_v10 = vld [vmem:[%s2373_s16 + $0x18] sm:$0xff]   ;;  %v1848_v14 = vld [vmem:[%s2373_s16 + $0x10] sm:$0xff]  }
  0x9f   : > { %v1855_v12 = vld [vmem:[%s2365_s27 + $0x4] ss:$8 sps:$4 sm:$0xff]   ;;  %v1853_v19 = vld [vmem:[%s2365_s27] ss:$8 sps:$4 sm:$0xff]   ;;  %v1859_v21 = vld [vmem:[%s2365_s27 + $0x14] ss:$8 sps:$4 sm:$0xff]  }
  0xa0   : > { %v1858_v13 = vld [vmem:[%s2365_s27 + $0x84] ss:$8 sps:$4 sm:$0xff]   ;;  %711 = vmatprep.mubr.bf16.mxu0 %v1855_v12  ;;  %v1856_v20 = vld [vmem:[%s2365_s27 + $0x80] ss:$8 sps:$4 sm:$0xff]   ;;  %v1861_v22 = vld [vmem:[%s2365_s27 + $0x94] ss:$8 sps:$4 sm:$0xff]  }
  0xa1   : > { %1563 = vmatpush3.bf16.msra.mxu0 %v1840_v4  ;;  %1681 = vmatpush3.bf16.msra.mxu1 %v1840_v4  ;;  %v1849_v15 = vld [vmem:[%s2373_s16 + $0x48] sm:$0xff]   ;;  %v1851_v17 = vld [vmem:[%s2373_s16 + $0x40] sm:$0xff]   ;;  %v1863_v23 = vld [vmem:[%s2365_s27 + $0x10] ss:$8 sps:$4 sm:$0xff]   ;;  %p1391_p2 = scmp.ne.s32.totalorder %s2636_s29, 6 }
  0xa2   : > { %1564 = vmatprep.subr.bf16.mxu0 %v1841_v5  ;;  %1674 = vmatprep.subr.bf16.mxu1 %v1841_v5  ;;  %v1850_v16 = vld [vmem:[%s2373_s16 + $0x8] sm:$0xff]   ;;  %v1852_v18 = vld [vmem:[%s2373_s16] sm:$0xff]   ;;  %v1864_v24 = vld [vmem:[%s2365_s27 + $0x90] ss:$8 sps:$4 sm:$0xff]  }
  0xa3   : > { %775 = vmatprep.mubr.bf16.mxu1 %v1858_v13  ;;  %v1865_v25 = vld [vmem:[%s2365_s27 + $0x24] ss:$8 sps:$4 sm:$0xff]   ;;  %v1869_v27 = vld [vmem:[%s2365_s27 + $0x20] ss:$8 sps:$4 sm:$0xff]   ;;  %v1871_v29 = vld [vmem:[%s2365_s27 + $0x34] ss:$8 sps:$4 sm:$0xff]  }
  0xa4   : > { %v1867_v26 = vld [vmem:[%s2365_s27 + $0xa4] ss:$8 sps:$4 sm:$0xff]   ;;  %v1870_v28 = vld [vmem:[%s2365_s27 + $0xa0] ss:$8 sps:$4 sm:$0xff]   ;;  %v1873_v30 = vld [vmem:[%s2365_s27 + $0xb4] ss:$8 sps:$4 sm:$0xff]  }
  0xa5   : > { %1565 = vmatpush3.bf16.msra.mxu0 %v1842_v6  ;;  %1682 = vmatpush3.bf16.msra.mxu1 %v1842_v6  ;;  %v1875_v31 = vld [vmem:[%s2365_s27 + $0x30] ss:$8 sps:$4 sm:$0xff]   ;;  %v1877_v33 = vld [vmem:[%s2365_s27 + $0x44] ss:$8 sps:$4 sm:$0xff]   ;;  %v1881_v35 = vld [vmem:[%s2365_s27 + $0x40] ss:$8 sps:$4 sm:$0xff]  }
  0xa6   : > { %1566 = vmatprep.subr.bf16.mxu0 %v1843_v7  ;;  %1675 = vmatprep.subr.bf16.mxu1 %v1843_v7  ;;  %v1876_v32 = vld [vmem:[%s2365_s27 + $0xb0] ss:$8 sps:$4 sm:$0xff]   ;;  %v1879_v34 = vld [vmem:[%s2365_s27 + $0xc4] ss:$8 sps:$4 sm:$0xff]   ;;  %v1882_v36 = vld [vmem:[%s2365_s27 + $0xc0] ss:$8 sps:$4 sm:$0xff]  }
  0xa7   : > { %v1883_v37 = vld [vmem:[%s2365_s27 + $0x54] ss:$8 sps:$4 sm:$0xff]   ;;  %v1887_v39 = vld [vmem:[%s2365_s27 + $0x50] ss:$8 sps:$4 sm:$0xff]   ;;  %v1889_v41 = vld [vmem:[%s2365_s27 + $0x64] ss:$8 sps:$4 sm:$0xff]  }
  0xa8   : > { %v1885_v38 = vld [vmem:[%s2365_s27 + $0xd4] ss:$8 sps:$4 sm:$0xff]   ;;  %v1888_v40 = vld [vmem:[%s2365_s27 + $0xd0] ss:$8 sps:$4 sm:$0xff]   ;;  %v1891_v42 = vld [vmem:[%s2365_s27 + $0xe4] ss:$8 sps:$4 sm:$0xff]  }
  0xa9   : > { %1567 = vmatpush3.bf16.msra.mxu0 %v1844_v8  ;;  %1683 = vmatpush3.bf16.msra.mxu1 %v1844_v8  ;;  %v1893_v43 = vld [vmem:[%s2365_s27 + $0x60] ss:$8 sps:$4 sm:$0xff]   ;;  %v1895_v45 = vld [vmem:[%s2365_s27 + $0x74] ss:$8 sps:$4 sm:$0xff]   ;;  %v1899_v47 = vld [vmem:[%s2365_s27 + $0x70] ss:$8 sps:$4 sm:$0xff]  }
  0xaa   : > { %1568 = vmatprep.subr.bf16.mxu0 %v1845_v9  ;;  %1676 = vmatprep.subr.bf16.mxu1 %v1845_v9  ;;  %v1894_v44 = vld [vmem:[%s2365_s27 + $0xe0] ss:$8 sps:$4 sm:$0xff]   ;;  %v1897_v46 = vld [vmem:[%s2365_s27 + $0xf4] ss:$8 sps:$4 sm:$0xff]   ;;  %v1900_v48 = vld [vmem:[%s2365_s27 + $0xf0] ss:$8 sps:$4 sm:$0xff]  }
  0xab   : > { %v327_v51 = vld [vmem:[#allocation2 + $0xb0] sm:$0xff]  ;;  %v343_v53 = vld [vmem:[#allocation2 + $0x38] sm:$0xff]  ;;  %v328_v61 = vld [vmem:[#allocation2] sm:$0xff] }
  0xac   : > { %v344_v63 = vld [vmem:[#allocation2 + $0x58] sm:$0xff]  ;;  %v345_v9 = vld [vmem:[#allocation2 + $0x40] sm:$0xff] }
  0xad   : > { %1569 = vmatpush3.bf16.msra.mxu0 %v1846_v10  ;;  %1684 = vmatpush3.bf16.msra.mxu1 %v1846_v10  ;;  %v329_v7 = vld [vmem:[#allocation2 + $0xd8] sm:$0xff] }
  0xae   : > { %1570 = vmatprep.subr.bf16.mxu0 %v1847_v11  ;;  %1677 = vmatprep.subr.bf16.mxu1 %v1847_v11 }
  0xb1   : > { %1571 = vmatpush3.bf16.msra.mxu0 %v1848_v14  ;;  %1685 = vmatpush3.bf16.msra.mxu1 %v1848_v14 }
  0xb2   : > { %1572 = vmatprep.subr.bf16.mxu0 %v1849_v15  ;;  %1678 = vmatprep.subr.bf16.mxu1 %v1849_v15 }
  0xb5   : > { %1573 = vmatpush3.bf16.msra.mxu0 %v1850_v16  ;;  %1686 = vmatpush3.bf16.msra.mxu1 %v1850_v16 }
  0xb6   : > { %1574 = vmatprep.subr.bf16.mxu0 %v1851_v17  ;;  %1679 = vmatprep.subr.bf16.mxu1 %v1851_v17  ;;  %v330_v17 = vld [vmem:[#allocation2 + $0x18] sm:$0xff] }
  0xb9   : > { %1575 = vmatpush3.bf16.msra.mxu0 %v1852_v18  ;;  %1687 = vmatpush3.bf16.msra.mxu1 %v1852_v18 }
  0xbc   : > { %712 = vmatmul.mubr.bf16.vlgmr.msra.gmra.mxu0 %v1853_v19  ;;  %776 = vmatmul.mubr.bf16.vlgmr.msra.gmra.mxu1 %v1856_v20  ;;  %v346_v19 = vld [vmem:[#allocation2 + $0xc8] sm:$0xff] }
  0xbd   : > { %719 = vmatprep.mubr.bf16.mxu0 %v1859_v21  ;;  %783 = vmatprep.mubr.bf16.mxu1 %v1861_v22 }
  0xc4   : > { %720 = vmatmul.mubr.bf16.gmra.mxu0 %v1863_v23  ;;  %784 = vmatmul.mubr.bf16.gmra.mxu1 %v1864_v24 }
  0xc5   : > { %727 = vmatprep.mubr.bf16.mxu0 %v1865_v25  ;;  %791 = vmatprep.mubr.bf16.mxu1 %v1867_v26 }
  0xcc   : > { %728 = vmatmul.mubr.bf16.gmra.mxu0 %v1869_v27  ;;  %792 = vmatmul.mubr.bf16.gmra.mxu1 %v1870_v28  ;;  %v331_v27 = vld [vmem:[#allocation2 + $0x50] sm:$0xff] }
  0xcd   : > { %735 = vmatprep.mubr.bf16.mxu0 %v1871_v29  ;;  %799 = vmatprep.mubr.bf16.mxu1 %v1873_v30  ;;  %v347_v29 = vld [vmem:[#allocation2 + $0xe0] sm:$0xff] }
  0xd4   : > { %736 = vmatmul.mubr.bf16.gmra.mxu0 %v1875_v31  ;;  %800 = vmatmul.mubr.bf16.gmra.mxu1 %v1876_v32 }
  0xd5   : > { %743 = vmatprep.mubr.bf16.mxu0 %v1877_v33  ;;  %807 = vmatprep.mubr.bf16.mxu1 %v1879_v34 }
  0xdc   : > { %744 = vmatmul.mubr.bf16.gmra.mxu0 %v1881_v35  ;;  %808 = vmatmul.mubr.bf16.gmra.mxu1 %v1882_v36 }
  0xdd   : > { %751 = vmatprep.mubr.bf16.mxu0 %v1883_v37  ;;  %815 = vmatprep.mubr.bf16.mxu1 %v1885_v38  ;;  %v332_v37 = vld [vmem:[#allocation2 + $0x68] sm:$0xff] }
  0xe4   : > { %752 = vmatmul.mubr.bf16.gmra.mxu0 %v1887_v39  ;;  %816 = vmatmul.mubr.bf16.gmra.mxu1 %v1888_v40  ;;  %v348_v39 = vld [vmem:[#allocation2 + $0x90] sm:$0xff] }
  0xe5   : > { %759 = vmatprep.mubr.bf16.mxu0 %v1889_v41  ;;  %823 = vmatprep.mubr.bf16.mxu1 %v1891_v42 }
  0xec   : > { %760 = vmatmul.mubr.bf16.gmra.mxu0 %v1893_v43  ;;  %824 = vmatmul.mubr.bf16.gmra.mxu1 %v1894_v44 }
  0xed   : > { %767 = vmatprep.mubr.bf16.mxu0 %v1895_v45  ;;  %831 = vmatprep.mubr.bf16.mxu1 %v1897_v46 }
  0xf4   : > { %768 = vmatmul.mubr.bf16.gmra.mxu0 %v1899_v47  ;;  %832 = vmatmul.mubr.bf16.gmra.mxu1 %v1900_v48  ;;  %v333_v47 = vld [vmem:[#allocation2 + $0x30] sm:$0xff] }
 0x17c   : > { %v1576_v49 = vpop.f32.mrf.mxu0  ;;  %v1624_v50 = vpop.f32.mrf.mxu1 }
 0x17e   : > { %v1577_v52 = vpop.f32.mrf.mxu0  ;;  %v1625_v54 = vpop.f32.mrf.mxu1 }
 0x17f   : > { %v1578_v55 = vadd.f32 %v1577_v52, %v1576_v49  ;;  %v1626_v56 = vadd.f32 %v1625_v54, %v1624_v50  ;;  %v349_v49 = vld [vmem:[#allocation2 + $0x70] sm:$0xff] }
 0x180   : > { %v1579_v57 = vpop.f32.mrf.mxu0  ;;  %v1627_v58 = vpop.f32.mrf.mxu1 }
 0x181   : > { %v840_v59 = vadd.f32 %v1578_v55, %v327_v51  ;;  %v856_v60 = vadd.f32 %v1626_v56, %v343_v53 }
 0x182   : > { %v1580_v62 = vpop.f32.mrf.mxu0  ;;  %v1628_v0 = vpop.f32.mrf.mxu1 }
 0x183   : > { %872 = vst [vmem:[#allocation2 + $0xb0] sm:$0xff] %v840_v59  ;;  %888 = vst [vmem:[#allocation2 + $0x38] sm:$0xff] %v856_v60  ;;  %v1581_v1 = vadd.f32 %v1580_v62, %v1579_v57  ;;  %v1629_v2 = vadd.f32 %v1628_v0, %v1627_v58  ;;  %v334_v57 = vld [vmem:[#allocation2 + $0x48] sm:$0xff]  ;;  %v350_v59 = vld [vmem:[#allocation2 + $0xc0] sm:$0xff] }
 0x184   : > { %v1582_v3 = vpop.f32.mrf.mxu0  ;;  %v1630_v4 = vpop.f32.mrf.mxu1 }
 0x185   : > { %v841_v5 = vadd.f32 %v1581_v1, %v328_v61  ;;  %v857_v6 = vadd.f32 %v1629_v2, %v344_v63 }
 0x186   : > { %v1583_v8 = vpop.f32.mrf.mxu0  ;;  %v1631_v10 = vpop.f32.mrf.mxu1 }
 0x187   : > { %873 = vst [vmem:[#allocation2] sm:$0xff] %v841_v5  ;;  %889 = vst [vmem:[#allocation2 + $0x58] sm:$0xff] %v857_v6  ;;  %v1584_v11 = vadd.f32 %v1583_v8, %v1582_v3  ;;  %v1632_v12 = vadd.f32 %v1631_v10, %v1630_v4  ;;  %v335_v3 = vld [vmem:[#allocation2 + $0x80] sm:$0xff]  ;;  %v351_v5 = vld [vmem:[#allocation2 + $0xa8] sm:$0xff] }
 0x188   : > { %v1585_v13 = vpop.f32.mrf.mxu0  ;;  %v1633_v14 = vpop.f32.mrf.mxu1 }
 0x189   : > { %v842_v15 = vadd.f32 %v1584_v11, %v329_v7  ;;  %v858_v16 = vadd.f32 %v1632_v12, %v345_v9 }
 0x18a   : > { %v1586_v18 = vpop.f32.mrf.mxu0  ;;  %v1634_v20 = vpop.f32.mrf.mxu1 }
 0x18b   : > { %874 = vst [vmem:[#allocation2 + $0xd8] sm:$0xff] %v842_v15  ;;  %890 = vst [vmem:[#allocation2 + $0x40] sm:$0xff] %v858_v16  ;;  %v1587_v21 = vadd.f32 %v1586_v18, %v1585_v13  ;;  %v1635_v22 = vadd.f32 %v1634_v20, %v1633_v14  ;;  %v336_v13 = vld [vmem:[#allocation2 + $0x88] sm:$0xff]  ;;  %v352_v15 = vld [vmem:[#allocation2 + $0xd0] sm:$0xff] }
 0x18c   : > { %v1588_v23 = vpop.f32.mrf.mxu0  ;;  %v1636_v24 = vpop.f32.mrf.mxu1 }
 0x18d   : > { %v843_v25 = vadd.f32 %v1587_v21, %v330_v17  ;;  %v859_v26 = vadd.f32 %v1635_v22, %v346_v19 }
 0x18e   : > { %v1589_v28 = vpop.f32.mrf.mxu0  ;;  %v1637_v30 = vpop.f32.mrf.mxu1 }
 0x18f   : > { %875 = vst [vmem:[#allocation2 + $0x18] sm:$0xff] %v843_v25  ;;  %891 = vst [vmem:[#allocation2 + $0xc8] sm:$0xff] %v859_v26  ;;  %v1590_v31 = vadd.f32 %v1589_v28, %v1588_v23  ;;  %v1638_v32 = vadd.f32 %v1637_v30, %v1636_v24  ;;  %v337_v23 = vld [vmem:[#allocation2 + $0xe8] sm:$0xff]  ;;  %v353_v25 = vld [vmem:[#allocation2 + $0x10] sm:$0xff] }
 0x190   : > { %v1591_v33 = vpop.f32.mrf.mxu0  ;;  %v1639_v34 = vpop.f32.mrf.mxu1 }
 0x191   : > { %v844_v35 = vadd.f32 %v1590_v31, %v331_v27  ;;  %v860_v36 = vadd.f32 %v1638_v32, %v347_v29 }
 0x192   : > { %v1592_v38 = vpop.f32.mrf.mxu0  ;;  %v1640_v40 = vpop.f32.mrf.mxu1 }
 0x193   : > { %876 = vst [vmem:[#allocation2 + $0x50] sm:$0xff] %v844_v35  ;;  %892 = vst [vmem:[#allocation2 + $0xe0] sm:$0xff] %v860_v36  ;;  %v1593_v41 = vadd.f32 %v1592_v38, %v1591_v33  ;;  %v1641_v42 = vadd.f32 %v1640_v40, %v1639_v34  ;;  %v338_v33 = vld [vmem:[#allocation2 + $0xb8] sm:$0xff]  ;;  %v354_v35 = vld [vmem:[#allocation2 + $0x28] sm:$0xff] }
 0x194   : > { %v1594_v43 = vpop.f32.mrf.mxu0  ;;  %v1642_v44 = vpop.f32.mrf.mxu1 }
 0x195   : > { %v845_v45 = vadd.f32 %v1593_v41, %v332_v37  ;;  %v861_v46 = vadd.f32 %v1641_v42, %v348_v39 }
 0x196   : > { %v1595_v48 = vpop.f32.mrf.mxu0  ;;  %v1643_v50 = vpop.f32.mrf.mxu1 }
 0x197   : > { %877 = vst [vmem:[#allocation2 + $0x68] sm:$0xff] %v845_v45  ;;  %893 = vst [vmem:[#allocation2 + $0x90] sm:$0xff] %v861_v46  ;;  %v1596_v51 = vadd.f32 %v1595_v48, %v1594_v43  ;;  %v1644_v52 = vadd.f32 %v1643_v50, %v1642_v44  ;;  %v339_v43 = vld [vmem:[#allocation2 + $0x60] sm:$0xff] }
 0x198   : > { %v1597_v53 = vpop.f32.mrf.mxu0  ;;  %v1645_v54 = vpop.f32.mrf.mxu1  ;;  %v355_v45 = vld [vmem:[#allocation2 + $0xa0] sm:$0xff] }
 0x199   : > { %v846_v55 = vadd.f32 %v1596_v51, %v333_v47  ;;  %v862_v56 = vadd.f32 %v1644_v52, %v349_v49 }
 0x19a   : > { %v1598_v58 = vpop.f32.mrf.mxu0  ;;  %v1646_v60 = vpop.f32.mrf.mxu1 }
 0x19b   : > { %878 = vst [vmem:[#allocation2 + $0x30] sm:$0xff] %v846_v55  ;;  %894 = vst [vmem:[#allocation2 + $0x70] sm:$0xff] %v862_v56  ;;  %v1599_v61 = vadd.f32 %v1598_v58, %v1597_v53  ;;  %v1647_v62 = vadd.f32 %v1646_v60, %v1645_v54  ;;  %v340_v53 = vld [vmem:[#allocation2 + $0xf0] sm:$0xff]  ;;  %v356_v55 = vld [vmem:[#allocation2 + $0xf8] sm:$0xff] }
 0x19c   : > { %v1600_v63 = vpop.f32.mrf.mxu0  ;;  %v1648_v0 = vpop.f32.mrf.mxu1 }
 0x19d   : > { %v847_v1 = vadd.f32 %v1599_v61, %v334_v57  ;;  %v863_v2 = vadd.f32 %v1647_v62, %v350_v59 }
 0x19e   : > { %v1601_v4 = vpop.f32.mrf.mxu0  ;;  %v1649_v6 = vpop.f32.mrf.mxu1 }
 0x19f   : > { %879 = vst [vmem:[#allocation2 + $0x48] sm:$0xff] %v847_v1  ;;  %895 = vst [vmem:[#allocation2 + $0xc0] sm:$0xff] %v863_v2  ;;  %v1602_v7 = vadd.f32 %v1601_v4, %v1600_v63  ;;  %v1650_v8 = vadd.f32 %v1649_v6, %v1648_v0  ;;  %v341_v63 = vld [vmem:[#allocation2 + $0x8] sm:$0xff]  ;;  %v357_v1 = vld [vmem:[#allocation2 + $0x20] sm:$0xff] }
 0x1a0   : > { %v1603_v9 = vpop.f32.mrf.mxu0  ;;  %v1651_v10 = vpop.f32.mrf.mxu1 }
 0x1a1   : > { %v848_v11 = vadd.f32 %v1602_v7, %v335_v3  ;;  %v864_v12 = vadd.f32 %v1650_v8, %v351_v5 }
 0x1a2   : > { %v1604_v14 = vpop.f32.mrf.mxu0  ;;  %v1652_v16 = vpop.f32.mrf.mxu1 }
 0x1a3   : > { %880 = vst [vmem:[#allocation2 + $0x80] sm:$0xff] %v848_v11  ;;  %896 = vst [vmem:[#allocation2 + $0xa8] sm:$0xff] %v864_v12  ;;  %v1605_v17 = vadd.f32 %v1604_v14, %v1603_v9  ;;  %v1653_v18 = vadd.f32 %v1652_v16, %v1651_v10  ;;  %v342_v9 = vld [vmem:[#allocation2 + $0x78] sm:$0xff] }
 0x1a4   : > { %v1606_v19 = vpop.f32.mrf.mxu0  ;;  %v1654_v20 = vpop.f32.mrf.mxu1  ;;  %v358_v11 = vld [vmem:[#allocation2 + $0x98] sm:$0xff] }
 0x1a5   : > { %v849_v21 = vadd.f32 %v1605_v17, %v336_v13  ;;  %v865_v22 = vadd.f32 %v1653_v18, %v352_v15 }
 0x1a6   : > { %v1607_v24 = vpop.f32.mrf.mxu0  ;;  %v1655_v26 = vpop.f32.mrf.mxu1 }
 0x1a7   : > { %881 = vst [vmem:[#allocation2 + $0x88] sm:$0xff] %v849_v21  ;;  %897 = vst [vmem:[#allocation2 + $0xd0] sm:$0xff] %v865_v22  ;;  %v1608_v27 = vadd.f32 %v1607_v24, %v1606_v19  ;;  %v1656_v28 = vadd.f32 %v1655_v26, %v1654_v20 }
 0x1a8   : > { %v1609_v29 = vpop.f32.mrf.mxu0  ;;  %v1657_v30 = vpop.f32.mrf.mxu1 }
 0x1a9   : > { %v850_v31 = vadd.f32 %v1608_v27, %v337_v23  ;;  %v866_v32 = vadd.f32 %v1656_v28, %v353_v25 }
 0x1aa   : > { %v1610_v34 = vpop.f32.mrf.mxu0  ;;  %v1658_v36 = vpop.f32.mrf.mxu1 }
 0x1ab   : > { %882 = vst [vmem:[#allocation2 + $0xe8] sm:$0xff] %v850_v31  ;;  %898 = vst [vmem:[#allocation2 + $0x10] sm:$0xff] %v866_v32  ;;  %v1611_v37 = vadd.f32 %v1610_v34, %v1609_v29  ;;  %v1659_v38 = vadd.f32 %v1658_v36, %v1657_v30 }
 0x1ac   : > { %v1612_v39 = vpop.f32.mrf.mxu0  ;;  %v1660_v40 = vpop.f32.mrf.mxu1 }
 0x1ad   : > { %v851_v41 = vadd.f32 %v1611_v37, %v338_v33  ;;  %v867_v42 = vadd.f32 %v1659_v38, %v354_v35 }
 0x1ae   : > { %v1613_v44 = vpop.f32.mrf.mxu0  ;;  %v1661_v46 = vpop.f32.mrf.mxu1 }
 0x1af   : > { %883 = vst [vmem:[#allocation2 + $0xb8] sm:$0xff] %v851_v41  ;;  %899 = vst [vmem:[#allocation2 + $0x28] sm:$0xff] %v867_v42  ;;  %v1614_v47 = vadd.f32 %v1613_v44, %v1612_v39  ;;  %v1662_v48 = vadd.f32 %v1661_v46, %v1660_v40 }
 0x1b0   : > { %v1615_v49 = vpop.f32.mrf.mxu0  ;;  %v1663_v50 = vpop.f32.mrf.mxu1 }
 0x1b1   : > { %v852_v51 = vadd.f32 %v1614_v47, %v339_v43  ;;  %v868_v52 = vadd.f32 %v1662_v48, %v355_v45 }
 0x1b2   : > { %v1616_v54 = vpop.f32.mrf.mxu0  ;;  %v1664_v56 = vpop.f32.mrf.mxu1 }
 0x1b3   : > { %884 = vst [vmem:[#allocation2 + $0x60] sm:$0xff] %v852_v51  ;;  %900 = vst [vmem:[#allocation2 + $0xa0] sm:$0xff] %v868_v52  ;;  %v1617_v57 = vadd.f32 %v1616_v54, %v1615_v49  ;;  %v1665_v58 = vadd.f32 %v1664_v56, %v1663_v50 }
 0x1b4   : > { %v1618_v59 = vpop.f32.mrf.mxu0  ;;  %v1666_v60 = vpop.f32.mrf.mxu1 }
 0x1b5   : > { %v853_v61 = vadd.f32 %v1617_v57, %v340_v53  ;;  %v869_v62 = vadd.f32 %v1665_v58, %v356_v55 }
 0x1b6   : > { %v1619_v0 = vpop.f32.mrf.mxu0  ;;  %v1667_v2 = vpop.f32.mrf.mxu1 }
 0x1b7   : > { %885 = vst [vmem:[#allocation2 + $0xf0] sm:$0xff] %v853_v61  ;;  %901 = vst [vmem:[#allocation2 + $0xf8] sm:$0xff] %v869_v62  ;;  %v1620_v3 = vadd.f32 %v1619_v0, %v1618_v59  ;;  %v1668_v4 = vadd.f32 %v1667_v2, %v1666_v60 }
 0x1b8   : > { %v1621_v5 = vpop.f32.mrf.mxu0  ;;  %v1669_v6 = vpop.f32.mrf.mxu1 }
 0x1b9   : > { %v854_v7 = vadd.f32 %v1620_v3, %v341_v63  ;;  %v870_v8 = vadd.f32 %v1668_v4, %v357_v1 }
 0x1ba   : > { %v1622_v10 = vpop.f32.mrf.mxu0  ;;  %v1670_v12 = vpop.f32.mrf.mxu1 }
 0x1bb   : > { %886 = vst [vmem:[#allocation2 + $0x8] sm:$0xff] %v854_v7  ;;  %902 = vst [vmem:[#allocation2 + $0x20] sm:$0xff] %v870_v8  ;;  %v1623_v13 = vadd.f32 %v1622_v10, %v1621_v5  ;;  %v1671_v14 = vadd.f32 %v1670_v12, %v1669_v6  ;;  %907 = sbr.rel (%p1391_p2) target bundleno = 474 (0x1da), region = 52 }
 0x1bd   : > { %v855_v15 = vadd.f32 %v1623_v13, %v342_v9  ;;  %v871_v16 = vadd.f32 %v1671_v14, %v358_v11 }
 0x1bf   : > { %887 = vst [vmem:[#allocation2 + $0x78] sm:$0xff] %v855_v15  ;;  %903 = vst [vmem:[#allocation2 + $0x98] sm:$0xff] %v871_v16 }
 0x1c0   : > { %v908_v17 = vld [vmem:[#allocation2 + $0xb0] sm:$0xff]  ;;  %v909_v18 = vld [vmem:[#allocation2] sm:$0xff]  ;;  %v910_v22 = vld [vmem:[#allocation2 + $0xd8] sm:$0xff] }
 0x1c1   : > { %v2438_v19 = vld [vmem:[#allocation8] ss:$0 sm:$0xff]  ;;  %v911_v23 = vld [vmem:[#allocation2 + $0x18] sm:$0xff]  ;;  %v912_v24 = vld [vmem:[#allocation2 + $0x50] sm:$0xff] }
 0x1c2   : > { %v947_v20 = vadd.f32 %v2438_v19, %v908_v17  ;;  %v948_v21 = vadd.f32 %v2438_v19, %v909_v18  ;;  %v949_v25 = vadd.f32 %v2438_v19, %v910_v22  ;;  %v950_v26 = vadd.f32 %v2438_v19, %v911_v23  ;;  %v913_v27 = vld [vmem:[#allocation2 + $0x68] sm:$0xff]  ;;  %v914_v29 = vld [vmem:[#allocation2 + $0x30] sm:$0xff]  ;;  %v916_v35 = vld [vmem:[#allocation2 + $0x80] sm:$0xff] }
 0x1c3   : > { %v951_v28 = vadd.f32 %v2438_v19, %v912_v24  ;;  %v915_v30 = vld [vmem:[#allocation2 + $0x48] sm:$0xff]  ;;  %v952_v33 = vadd.f32 %v2438_v19, %v913_v27  ;;  %v953_v34 = vadd.f32 %v2438_v19, %v914_v29  ;;  %v919_v42 = vld [vmem:[#allocation2 + $0xb8] sm:$0xff]  ;;  %v920_v43 = vld [vmem:[#allocation2 + $0x60] sm:$0xff]  ;;  %v955_v47 = vadd.f32 %v2438_v19, %v916_v35 }
 0x1c4   : > { %v979_v31 = vmax.f32 %v947_v20, 0.0  ;;  %v980_v32 = vmax.f32 %v948_v21, 0.0  ;;  %v917_v36 = vld [vmem:[#allocation2 + $0x88] sm:$0xff]  ;;  %v981_v38 = vmax.f32 %v949_v25, 0.0  ;;  %v982_v39 = vmax.f32 %v950_v26, 0.0  ;;  %v921_v48 = vld [vmem:[#allocation2 + $0xf0] sm:$0xff] }
 0x1c5   : > { %v918_v37 = vld [vmem:[#allocation2 + $0xe8] sm:$0xff]  ;;  %v983_v40 = vmax.f32 %v951_v28, 0.0  ;;  %v954_v41 = vadd.f32 %v2438_v19, %v915_v30  ;;  %v984_v45 = vmax.f32 %v952_v33, 0.0  ;;  %v985_v46 = vmax.f32 %v953_v34, 0.0  ;;  %v924_v59 = vld [vmem:[#allocation2 + $0x38] sm:$0xff]  ;;  %v926_v1 = vld [vmem:[#allocation2 + $0x40] sm:$0xff] }
 0x1c6   : > { %v1468_v44 = vpack.c.bf16 %v980_v32, %v979_v31  ;;  %v1473_v49 = vpack.c.bf16 %v982_v39, %v981_v38  ;;  %v956_v51 = vadd.f32 %v2438_v19, %v917_v36  ;;  %v957_v52 = vadd.f32 %v2438_v19, %v918_v37  ;;  %v922_v53 = vld [vmem:[#allocation2 + $0x8] sm:$0xff]  ;;  %v923_v54 = vld [vmem:[#allocation2 + $0x78] sm:$0xff]  ;;  %v928_v11 = vld [vmem:[#allocation2 + $0xe0] sm:$0xff] }
 0x1c7   : > { %v986_v50 = vmax.f32 %v954_v41, 0.0  ;;  %v1478_v55 = vpack.c.bf16 %v984_v45, %v983_v40  ;;  %v987_v56 = vmax.f32 %v955_v47, 0.0  ;;  %v958_v57 = vadd.f32 %v2438_v19, %v919_v42  ;;  %v925_v60 = vld [vmem:[#allocation2 + $0x58] sm:$0xff]  ;;  %v927_v6 = vld [vmem:[#allocation2 + $0xc8] sm:$0xff]  ;;  %v929_v12 = vld [vmem:[#allocation2 + $0x90] sm:$0xff] }
 0x1c8   : > { %1469 = vst [vmem:[%s2386_s12] sm:$0xff] %v1468_v44   ;;  %v959_v58 = vadd.f32 %v2438_v19, %v920_v43  ;;  %1545 = vst [vmem:[%s2386_s12 + $0x8] sm:$0xff] %v1473_v49   ;;  %v988_v62 = vmax.f32 %v956_v51, 0.0  ;;  %v989_v63 = vmax.f32 %v957_v52, 0.0  ;;  %v960_v0 = vadd.f32 %v2438_v19, %v921_v48  ;;  %v930_v17 = vld [vmem:[#allocation2 + $0x70] sm:$0xff]  ;;  %v931_v18 = vld [vmem:[#allocation2 + $0xc0] sm:$0xff] }
 0x1c9   : > { %v1483_v61 = vpack.c.bf16 %v986_v50, %v985_v46  ;;  %1546 = vst [vmem:[%s2386_s12 + $0x10] sm:$0xff] %v1478_v55   ;;  %v990_v2 = vmax.f32 %v958_v57, 0.0  ;;  %v961_v4 = vadd.f32 %v2438_v19, %v922_v53  ;;  %v962_v5 = vadd.f32 %v2438_v19, %v923_v54  ;;  %v932_v24 = vld [vmem:[#allocation2 + $0xa8] sm:$0xff]  ;;  %v933_v25 = vld [vmem:[#allocation2 + $0xd0] sm:$0xff]  ;;  %v936_v40 = vld [vmem:[#allocation2 + $0xa0] sm:$0xff] }
 0x1ca   : > { %v991_v3 = vmax.f32 %v959_v58, 0.0  ;;  %v1488_v7 = vpack.c.bf16 %v988_v62, %v987_v56  ;;  %v992_v8 = vmax.f32 %v960_v0, 0.0  ;;  %v963_v9 = vadd.f32 %v2438_v19, %v924_v59  ;;  %v934_v30 = vld [vmem:[#allocation2 + $0x10] sm:$0xff]  ;;  %v935_v35 = vld [vmem:[#allocation2 + $0x28] sm:$0xff]  ;;  %v937_v41 = vld [vmem:[#allocation2 + $0xf8] sm:$0xff] }
 0x1cb   : > { %1547 = vst [vmem:[%s2386_s12 + $0x18] sm:$0xff] %v1483_v61   ;;  %v964_v10 = vadd.f32 %v2438_v19, %v925_v60  ;;  %v1493_v13 = vpack.c.bf16 %v990_v2, %v989_v63  ;;  %v993_v14 = vmax.f32 %v961_v4, 0.0  ;;  %v994_v15 = vmax.f32 %v962_v5, 0.0  ;;  %v938_v46 = vld [vmem:[#allocation2 + $0x20] sm:$0xff]  ;;  %v939_v47 = vld [vmem:[#allocation2 + $0x98] sm:$0xff] }
 0x1cc   : > { %v965_v16 = vadd.f32 %v2438_v19, %v926_v1  ;;  %1548 = vst [vmem:[%s2386_s12 + $0x20] sm:$0xff] %v1488_v7   ;;  %v1498_v20 = vpack.c.bf16 %v992_v8, %v991_v3  ;;  %v995_v21 = vmax.f32 %v963_v9, 0.0  ;;  %v966_v23 = vadd.f32 %v2438_v19, %v927_v6 }
 0x1cd   : > { %v996_v22 = vmax.f32 %v964_v10, 0.0  ;;  %1549 = vst [vmem:[%s2386_s12 + $0x28] sm:$0xff] %v1493_v13   ;;  %v1503_v26 = vpack.c.bf16 %v994_v15, %v993_v14  ;;  %v967_v28 = vadd.f32 %v2438_v19, %v928_v11  ;;  %v968_v29 = vadd.f32 %v2438_v19, %v929_v12 }
 0x1ce   : > { %v997_v27 = vmax.f32 %v965_v16, 0.0  ;;  %1550 = vst [vmem:[%s2386_s12 + $0x30] sm:$0xff] %v1498_v20   ;;  %v998_v32 = vmax.f32 %v966_v23, 0.0  ;;  %v969_v33 = vadd.f32 %v2438_v19, %v930_v17  ;;  %v970_v34 = vadd.f32 %v2438_v19, %v931_v18 }
 0x1cf   : > { %v1508_v31 = vpack.c.bf16 %v996_v22, %v995_v21  ;;  %1551 = vst [vmem:[%s2386_s12 + $0x38] sm:$0xff] %v1503_v26   ;;  %v999_v36 = vmax.f32 %v967_v28, 0.0  ;;  %v1000_v37 = vmax.f32 %v968_v29, 0.0  ;;  %v971_v38 = vadd.f32 %v2438_v19, %v932_v24 }
 0x1d0   : > { %v972_v39 = vadd.f32 %v2438_v19, %v933_v25  ;;  %v1513_v42 = vpack.c.bf16 %v998_v32, %v997_v27  ;;  %v1001_v43 = vmax.f32 %v969_v33, 0.0  ;;  %v1002_v44 = vmax.f32 %v970_v34, 0.0 }
 0x1d1   : > { %1552 = vst [vmem:[%s2386_s12 + $0x40] sm:$0xff] %v1508_v31   ;;  %v973_v45 = vadd.f32 %v2438_v19, %v934_v30  ;;  %v1518_v48 = vpack.c.bf16 %v1000_v37, %v999_v36  ;;  %v1003_v49 = vmax.f32 %v971_v38, 0.0  ;;  %v974_v51 = vadd.f32 %v2438_v19, %v935_v35 }
 0x1d2   : > { %v1004_v50 = vmax.f32 %v972_v39, 0.0  ;;  %1553 = vst [vmem:[%s2386_s12 + $0x48] sm:$0xff] %v1513_v42   ;;  %v1523_v52 = vpack.c.bf16 %v1002_v44, %v1001_v43  ;;  %v975_v54 = vadd.f32 %v2438_v19, %v936_v40  ;;  %v976_v55 = vadd.f32 %v2438_v19, %v937_v41 }
 0x1d3   : > { %v1005_v53 = vmax.f32 %v973_v45, 0.0  ;;  %1554 = vst [vmem:[%s2386_s12 + $0x50] sm:$0xff] %v1518_v48   ;;  %v1006_v57 = vmax.f32 %v974_v51, 0.0  ;;  %v977_v58 = vadd.f32 %v2438_v19, %v938_v46  ;;  %v978_v59 = vadd.f32 %v2438_v19, %v939_v47 }
 0x1d4   : > { %v1528_v56 = vpack.c.bf16 %v1004_v50, %v1003_v49  ;;  %1555 = vst [vmem:[%s2386_s12 + $0x58] sm:$0xff] %v1523_v52   ;;  %v1007_v60 = vmax.f32 %v975_v54, 0.0  ;;  %v1008_v61 = vmax.f32 %v976_v55, 0.0 }
 0x1d5   : > { %v1533_v62 = vpack.c.bf16 %v1006_v57, %v1005_v53  ;;  %v1009_v63 = vmax.f32 %v977_v58, 0.0  ;;  %v1010_v0 = vmax.f32 %v978_v59, 0.0 }
 0x1d6   : > { %1556 = vst [vmem:[%s2386_s12 + $0x60] sm:$0xff] %v1528_v56   ;;  %v1538_v1 = vpack.c.bf16 %v1008_v61, %v1007_v60 }
 0x1d7   : > { %1557 = vst [vmem:[%s2386_s12 + $0x68] sm:$0xff] %v1533_v62   ;;  %v1543_v2 = vpack.c.bf16 %v1010_v0, %v1009_v63 }
 0x1d8   : > { %1558 = vst [vmem:[%s2386_s12 + $0x70] sm:$0xff] %v1538_v1  }
 0x1d9   : > { %1559 = vst [vmem:[%s2386_s12 + $0x78] sm:$0xff] %v1543_v2  }
 0x1da PF: > { %s2637_s22 = sld [smem:[#allocation18_spill]]  ;;  %s1189_s10 = sshll.u32 %s2386_s12, 4  ;;  %s2495_s10 = int_to_ptr.vmem [resolvable:$true] %s1189_s10 }
 0x1db   : > { %s2639_s6 = sld [smem:[#allocation22_spill]]  ;;  %s2499_s11 = scalar_lea.sflag [#allocation5], %s283_s7 }
 0x1dc   : > { %s2640_s0 = sld [smem:[#allocation28_spill]]  ;;  %s1983_s30 = scalar_lea.vmem %s2495_s10, 2048 }
 0x1dd   : > { %p1984_p8 = scmp.ne.s32.totalorder %s2495_s10, %s1983_s30  ;;  %s2145_s18 = smov [#allocation9]  }
 0x1de   : > { %s1987_s8 = sshll.u32 %s2145_s18, 4  ;;  %s1988_s8 = int_to_ptr.vmem [resolvable:$false] %s1987_s8 }
 0x1df   : > { %s1989_s16 = scalar_lea.vmem %s1988_s8, 4096  ;;  %p1990_p13 = scmp.lt.s32.totalorder %s2495_s10, %s1988_s8 }
 0x1e0   : > { %s1464_s28 = sshll.u32 %s2637_s22, 11  ;;  %p1991_p11 = scmp.lt.s32.totalorder %s1989_s16, %s1983_s30 }
 0x1e1   : > { %p2641_p1 = scmp.ne.s32.totalorder %s2639_s6, 0 }
 0x1e2   : > { %s2492_s9 = scalar_lea.hbm %s2640_s0, %s1464_s28  ;;  %p1992_p3 = por %p1991_p11, %p1990_p13 }
 0x1e3   : > { %p1985_p4 = pnand %p1984_p8, %p2641_p1 }
 0x1e5   : > { %p1986_p9 = pneg %p1985_p4 }
 0x1e7   : > { %p1993_p0 = pnand %p1992_p3, %p1986_p9 }
 0x1e9   : > { %1996 = shalt.err (!%p1993_p0)
}
 0x1ea   : > { %s1997_s26 = scalar_lea.hbm %s2492_s9, 2048  ;;  %s2001_s12 = scalar_lea.hbm %s2640_s0, 10240 }
 0x1eb   : > { %p1998_p5 = scmp.ne.s32.totalorder %s2492_s9, %s1997_s26  ;;  %p2002_p10 = scmp.lt.s32.totalorder %s2492_s9, %s2640_s0 }
 0x1ec   : > { %p2003_p12 = scmp.lt.s32.totalorder %s2001_s12, %s1997_s26 }
 0x1ed   : > { %p1999_p6 = pnand %p1998_p5, %p2641_p1 }
 0x1ee   : > { %p2004_p2 = por %p2003_p12, %p2002_p10 }
 0x1ef   : > { %p2000_p7 = pneg %p1999_p6 }
 0x1f1   : > { %p2005_p8 = pnand %p2004_p2, %p2000_p7 }
 0x1f3   : > { %2008 = shalt.err (!%p2005_p8)
}
 0x1f4   : > { %s2146_s22 = smov 64   ;;  %s2147_s3 = smov 4  }
 0x1f5   : > { %1696 = dma.vmem_to_hbm [thread:$0]  (%p2641_p1), %s2495_s10, 2048, %s2492_s9, %s2499_s11, %s2146_s22, %s2146_s22, %s2147_s3  }
 0x1f6 PF: > { %s2642_s28 = sld [smem:[#allocation14_spill]]  ;;  %p1716_p4 = scmp.ge.s32.totalorder %s2135_s25, 2 }
 0x1f7   : > { %s2643_s15 = sld [smem:[#allocation23_spill]] }
 0x1fc   : > { %s1204_s27 = sand.u32 1, %s2642_s28  }
 0x1fd   : > { %p2644_p9 = scmp.ne.s32.totalorder %s2643_s15, 0  ;;  %s1205_s30 = scalar_lea.sflag [#allocation5], %s1204_s27 }
 0x1ff   : > { %p1710_p13 = pnand %p1716_p4, %p2644_p9 }
 0x201   : > { %p1711_p11 = pneg %p1710_p13 }
 0x203   : > { %2078 = dma.done.wait (%p1711_p11), %s1205_s30, 2048  }
 0x204   : > { %2080 = vsyncadd (%p1711_p11), %s1205_s30, 4294965248  ;;  %s22_s25 = sadd.s32 1, %s2135_s25   ;;  %s2646_s12 = sld [smem:[#allocation15_spill]] }
 0x205   : > { %p2527_p3 = scmp.ge.s32.totalorder %s22_s25, 37   ;;  %s2647_s15 = sld [smem:[#allocation16_spill]] }
 0x206   : > { %s2648_s6 = sld [smem:[#allocation25_spill]]  ;;  %s2649_s9 = smov %s2335_s13 }
 0x207   : > { %s2650_s10 = sld [smem:[#allocation24_spill]]  ;;  %s2652_s13 = smov %s2091_s14 }
 0x208   : > { %s2653_s14 = smov %s2332_s21  ;;  %s2654_s16 = smov %s2103_s17 }
 0x209   : > { %s2656_s18 = smov %s2111_s19  ;;  %s2657_s19 = smov %s2115_s20 }
 0x20a   : > { %s2658_s20 = smov %s2649_s9  ;;  %s2659_s21 = smov %s2127_s23 }
 0x20b   : > { %s2660_s22 = smov %s2131_s24  ;;  %s2661_s23 = smov %s2664_s4 }
 0x20c   : > { %s2655_s17 = smov %s2648_s6  ;;  %21 = sbr.rel (!%p2527_p3) target bundleno = 16 (0x10), region = 102 }
 0x20d   : > { %s2662_s24 = smov %s2650_s10 }
 0x211   :  { %1210 = vsyncpa [#allocation4], 1 }
 0x212   :  { %1212 = vsyncpa [#allocation4 + $0x1], 1 }
 0x213   :  { %1213 = vsyncpa [#allocation7], 1 }
 0x214   :  { %1215 = vsyncpa [#allocation7 + $0x1], 1 }
 0x215   :  { %1216 = vsyncpa [#allocation5], 1 }
 0x216   :  { %1218 = vsyncpa [#allocation5 + $0x1], 1 }

</bundles_post_ra>
